<compile_context>
chip_gen: v7x
topology: tpu7x:2x2x1
jax: 0.10.0
libtpu: 0.0.40
codegen_flags: <defaults>
</compile_context>

<pallas_src>
import functools

import jax
import jax.numpy as jnp
import numpy as np
from jax.experimental import pallas as pl
from jax.experimental.pallas import tpu as pltpu


def _cdiv(a, b):
    return -(-a // b)


def _vmem_capacity_bytes():
    try:
        return int(pltpu.get_tpu_info().vmem_capacity_bytes)
    except Exception:
        return 128 << 20


def _loss_partials_kernel(yp_ref, yt_ref, sse_ref, reg_ref, *, threshold,
                          n_rows, tile_b, tiles_per_chunk, feat):
    c = pl.program_id(0)   # batch chunk (parallel -> 2-TC split on v7x)
    i = pl.program_id(1)   # tile within chunk (reduction axis)

    @pl.when(i == 0)
    def _():
        sse_ref[...] = jnp.zeros_like(sse_ref)
        reg_ref[...] = jnp.zeros_like(reg_ref)

    yp = yp_ref[...].astype(jnp.float32)
    yt = yt_ref[...].astype(jnp.float32)

    # Global row ids of this tile, using the UNCLAMPED tile index so that rows
    # past the true batch (partial last tile, or a fully out-of-range tile of
    # an uneven chunk split whose data is clamped to re-read the last valid
    # tile) are masked out.  Masking is select-based so unspecified data
    # (possibly NaN/Inf) can never leak into the accumulators.
    tile_idx = c * tiles_per_chunk + i
    row_ids = tile_idx * tile_b + jax.lax.broadcasted_iota(
        jnp.int32, (tile_b, 1), 0)
    row_valid = row_ids < n_rows

    # --- MSE partials: pure VPU accumulation. ---
    diff = yp - yt
    d2 = jnp.where(row_valid, diff * diff, 0.0)

    # --- Per-row regularization (keepdims -> native 2-D layout). ---
    near_zero = jnp.max(jnp.abs(yp), axis=1, keepdims=True) < threshold
    row_sum = jnp.sum(yp, axis=1, keepdims=True)
    reg = (row_sum - 100.0) ** 2
    keep = jnp.logical_and(row_valid, jnp.logical_not(near_zero))
    reg_masked = jnp.where(keep, reg, 0.0)

    if tile_b % 8 == 0:
        # (tile_b, D) -> (tile_b//8, 8, D) splits the sublane axis (tile
        # aligned); the axis-0 sums are just elementwise VPU adds into the
        # (8, D) / (8, 1) bins held in the resident output blocks.
        sse_ref[...] += jnp.sum(
            d2.reshape(tile_b // 8, 8, feat), axis=0)[None, :, :]
        reg_ref[...] += jnp.sum(
            reg_masked.reshape(tile_b // 8, 8, 1), axis=0)[None, :, :]
    else:
        # Tiny-batch fallback (tile_b == full batch < packing multiple):
        # reduce fully and deposit into sublane 0 only.
        sub0_d = jax.lax.broadcasted_iota(jnp.int32, (1, 8, feat), 1) == 0
        sub0_1 = jax.lax.broadcasted_iota(jnp.int32, (1, 8, 1), 1) == 0
        sse_ref[...] += jnp.where(
            sub0_d, jnp.sum(d2, axis=0, keepdims=True)[None, :, :], 0.0)
        reg_ref[...] += jnp.where(
            sub0_1, jnp.sum(reg_masked, axis=0, keepdims=True)[None, :, :], 0.0)


def custom_loss(y_pred, y_true, weight=0.01, threshold=1.0, tile_b=None,
                n_chunks=None):
    assert y_pred.shape == y_true.shape and y_pred.ndim == 2
    B, D = y_pred.shape
    itemsize = jnp.dtype(y_pred.dtype).itemsize

    # Sublane packing multiple (f32 -> 8, bf16 -> 16, int8/fp8 -> 32).
    sub_mult = max(8, 32 // itemsize)

    vmem_cap = _vmem_capacity_bytes()
    big_vmem = vmem_cap >= (100 << 20)       # v5e/v6e: 128 MiB; v7x: 64 MiB/TC
    # Per-input block budget in f32-EQUIVALENT bytes, so the in-kernel f32
    # upcast temporaries of bf16/int8 inputs are covered.
    max_blk_f32 = (16 << 20) if big_vmem else (6 << 20)

    if tile_b is None:
        rows_cap = max(sub_mult,
                       (max_blk_f32 // max(1, D * 4)) // sub_mult * sub_mult)
    else:
        rows_cap = _cdiv(max(1, int(tile_b)), sub_mult) * sub_mult

    if B >= sub_mult:
        tile_b = max(sub_mult, min(rows_cap, (B // sub_mult) * sub_mult))
    else:
        tile_b = B   # single block equal to the full (tiny) batch

    n_tiles = _cdiv(B, tile_b)
    if n_chunks is None:
        n_chunks = 2
    n_chunks = max(1, min(int(n_chunks), n_tiles))
    tiles_per_chunk = _cdiv(n_tiles, n_chunks)

    def in_map(c, i):
        t = c * tiles_per_chunk + i
        return (jnp.minimum(t, n_tiles - 1), 0)   # clamp fully-OOB tiles

    kernel = functools.partial(
        _loss_partials_kernel,
        threshold=float(threshold),
        n_rows=B,
        tile_b=tile_b,
        tiles_per_chunk=tiles_per_chunk,
        feat=D,
    )

    # VMEM budget: 2 inputs x 2 pipeline buffers + f32 upcast temporaries +
    # small partial outputs + headroom, capped at 80% of physical VMEM.
    blk_in = tile_b * D * itemsize
    blk_f32 = tile_b * D * 4
    est = 4 * blk_in + 3 * blk_f32 + 2 * (8 * D * 4 + 8 * 4) + (2 << 20)
    vmem_limit = int(min(int(0.80 * vmem_cap), max(32 << 20, est)))

    sse_parts, reg_parts = pl.pallas_call(
        kernel,
        out_shape=(
            jax.ShapeDtypeStruct((n_chunks, 8, D), jnp.float32),
            jax.ShapeDtypeStruct((n_chunks, 8, 1), jnp.float32),
        ),
        grid_spec=pltpu.PrefetchScalarGridSpec(
            num_scalar_prefetch=0,
            grid=(n_chunks, tiles_per_chunk),
            in_specs=[
                pl.BlockSpec((tile_b, D), in_map),
                pl.BlockSpec((tile_b, D), in_map),
            ],
            out_specs=(
                pl.BlockSpec((1, 8, D), lambda c, i: (c, 0, 0)),
                pl.BlockSpec((1, 8, 1), lambda c, i: (c, 0, 0)),
            ),
        ),
        compiler_params=pltpu.CompilerParams(
            dimension_semantics=("parallel", "arbitrary"),
            vmem_limit_bytes=vmem_limit,
        ),
    )(y_pred, y_true)

    # Tiny final reduce + scalar math in plain JAX (negligible vs. streaming).
    mse = jnp.sum(sse_parts) / jnp.float32(B * D)
    mean_reg = jnp.sum(reg_parts) / jnp.float32(B)
    return mse + jnp.float32(weight) * mean_reg


def custom_loss_ref(y_pred, y_true, weight=0.01, threshold=1.0):
    y_pred = y_pred.astype(jnp.float32)
    y_true = y_true.astype(jnp.float32)
    mse = jnp.mean((y_pred - y_true) ** 2)
    near = jnp.all(jnp.abs(y_pred) < threshold, axis=1)
    reg = (jnp.sum(y_pred, axis=1) - 100.0) ** 2
    reg = jnp.where(near, jnp.zeros_like(reg), reg)
    return mse + weight * jnp.mean(reg)


if __name__ == "__main__":
    key = jax.random.PRNGKey(0)
    k1, k2, k3, k4, k5, k6 = jax.random.split(key, 6)

    # Case 1: batch not divisible by 8 -> partial tile, in-kernel row masking.
    B1, D1 = 20, 128
    yp1 = jax.random.normal(k1, (B1, D1), dtype=jnp.float32)
    yp1 = yp1.at[: B1 // 2].multiply(0.001)   # some rows "near zero"
    yt1 = jax.random.normal(k2, (B1, D1), dtype=jnp.float32)
    out1 = jax.block_until_ready(custom_loss(yp1, yt1))
    ref1 = jax.block_until_ready(custom_loss_ref(yp1, yt1))
    np.testing.assert_allclose(np.asarray(out1), np.asarray(ref1),
                               rtol=2e-5, atol=1e-4)

    # Case 2: small tile + 2 chunks with odd tile count -> exercises the
    # clamped out-of-range tile and multi-step accumulation.
    out2 = jax.block_until_ready(custom_loss(yp1, yt1, tile_b=8, n_chunks=2))
    np.testing.assert_allclose(np.asarray(out2), np.asarray(ref1),
                               rtol=2e-5, atol=1e-4)

    # Case 3: multi-step default path on an even batch.
    B3, D3 = 32, 128
    yp3 = jax.random.normal(k3, (B3, D3), dtype=jnp.float32)
    yp3 = yp3.at[::3].multiply(0.0005)
    yt3 = jax.random.normal(k4, (B3, D3), dtype=jnp.float32)
    out3 = jax.block_until_ready(custom_loss(yp3, yt3, tile_b=8))
    ref3 = jax.block_until_ready(custom_loss_ref(yp3, yt3))
    np.testing.assert_allclose(np.asarray(out3), np.asarray(ref3),
                               rtol=2e-5, atol=1e-4)

    # Case 4: bf16 inputs -> dtype-aware (16-row) tile packing + f32 upcast.
    B4, D4 = 24, 256
    yp4 = jax.random.normal(k5, (B4, D4), dtype=jnp.float32)
    yp4 = yp4.at[1::4].multiply(0.0005)
    yp4 = yp4.astype(jnp.bfloat16)
    yt4 = jax.random.normal(k6, (B4, D4), dtype=jnp.float32).astype(jnp.bfloat16)
    out4 = jax.block_until_ready(custom_loss(yp4, yt4, tile_b=16, n_chunks=2))
    ref4 = jax.block_until_ready(custom_loss_ref(yp4, yt4))
    np.testing.assert_allclose(np.asarray(out4), np.asarray(ref4),
                               rtol=1e-3, atol=1e-2)

    print("KERNEL_OK")
</pallas_src>

<mosaic_0001>
module attributes {stable_mosaic.version = 11 : i64} {
  func.func @_loss_partials_kernel(%arg0: i32, %arg1: i32, %arg2: memref<16x128xf32, #tpu.memory_space<vmem>>, %arg3: memref<16x128xf32, #tpu.memory_space<vmem>>, %arg4: memref<1x8x128xf32, #tpu.memory_space<vmem>>, %arg5: memref<1x8x1xf32, #tpu.memory_space<vmem>>) attributes {dimension_semantics = [#tpu.dimension_semantics<parallel>, #tpu.dimension_semantics<arbitrary>], iteration_bounds = array<i64: 2, 1>, scalar_prefetch = 0 : i64, scratch_operands = 0 : i64, tpu.core_type = #tpu.core_type<tc>, window_params = [{transform_indices = @transform_0, window_bounds = array<i64: 16, 128>}, {transform_indices = @transform_1, window_bounds = array<i64: 16, 128>}, {transform_indices = @transform_2, window_bounds = array<i64: 1, 8, 128>}, {transform_indices = @transform_3, window_bounds = array<i64: 1, 8, 1>}]} {
    %c0_i32 = arith.constant 0 : i32
    %0 = arith.cmpi eq, %arg1, %c0_i32 : i32
    %1 = arith.extui %0 : i1 to i32
    %c0_i32_0 = arith.constant 0 : i32
    %2 = arith.cmpi ne, %1, %c0_i32_0 : i32
    scf.if %2 {
      %cst_24 = arith.constant 0.000000e+00 : f32
      %45 = vector.broadcast %cst_24 : f32 to vector<1x8x128xf32>
      %c0_25 = arith.constant 0 : index
      %c0_26 = arith.constant 0 : index
      %c0_27 = arith.constant 0 : index
      %46 = vector.load %arg4[%c0_25, %c0_26, %c0_27] : memref<1x8x128xf32, #tpu.memory_space<vmem>>, vector<1x8x128xf32>
      tpu.vector_store %arg4[%c0_25, %c0_26, %c0_27], %45 {strides = array<i32>} : memref<1x8x128xf32, #tpu.memory_space<vmem>>, vector<1x8x128xf32>,
      %cst_28 = arith.constant 0.000000e+00 : f32
      %47 = vector.broadcast %cst_28 : f32 to vector<1x8x1xf32>
      %c0_29 = arith.constant 0 : index
      %c0_30 = arith.constant 0 : index
      %c0_31 = arith.constant 0 : index
      %48 = vector.load %arg5[%c0_29, %c0_30, %c0_31] : memref<1x8x1xf32, #tpu.memory_space<vmem>>, vector<1x8x1xf32>
      tpu.vector_store %arg5[%c0_29, %c0_30, %c0_31], %47 {strides = array<i32>} : memref<1x8x1xf32, #tpu.memory_space<vmem>>, vector<1x8x1xf32>,
    } else {
    }
    %c0 = arith.constant 0 : index
    %c0_1 = arith.constant 0 : index
    %3 = vector.load %arg2[%c0, %c0_1] : memref<16x128xf32, #tpu.memory_space<vmem>>, vector<16x128xf32>
    %c0_2 = arith.constant 0 : index
    %c0_3 = arith.constant 0 : index
    %4 = vector.load %arg3[%c0_2, %c0_3] : memref<16x128xf32, #tpu.memory_space<vmem>>, vector<16x128xf32>
    %c1_i32 = arith.constant 1 : i32
    %5 = arith.muli %arg0, %c1_i32 : i32
    %6 = arith.addi %5, %arg1 : i32
    %c16_i32 = arith.constant 16 : i32
    %7 = arith.muli %6, %c16_i32 : i32
    %8 = tpu.iota {dimensions = array<i32: 0>} : vector<16x1xi32>
    %9 = vector.broadcast %7 : i32 to vector<16x1xi32>
    %10 = arith.addi %9, %8 : vector<16x1xi32>
    %c20_i32 = arith.constant 20 : i32
    %11 = vector.broadcast %c20_i32 : i32 to vector<16x1xi32>
    %12 = arith.cmpi slt, %10, %11 : vector<16x1xi32>
    %13 = arith.subf %3, %4 : vector<16x128xf32>
    %14 = arith.mulf %13, %13 : vector<16x128xf32>
    %cst = arith.constant 0.000000e+00 : f32
    %15 = vector.shape_cast %12 : vector<16x1xi1> to vector<16x1xi1>
    %16 = vector.broadcast %15 : vector<16x1xi1> to vector<16x128xi1>
    %17 = vector.broadcast %cst : f32 to vector<16x128xf32>
    %18 = arith.select %16, %14, %17 : vector<16x128xi1>, vector<16x128xf32>
    %19 = math.absf %3 : vector<16x128xf32>
    %cst_4 = arith.constant dense<0xFF800000> : vector<16xf32>
    %20 = vector.multi_reduction <maximumf>, %19, %cst_4 [1] : vector<16x128xf32> to vector<16xf32>
    %21 = vector.shape_cast %20 : vector<16xf32> to vector<16x1xf32>
    %cst_5 = arith.constant 1.000000e+00 : f32
    %22 = vector.broadcast %cst_5 : f32 to vector<16x1xf32>
    %23 = arith.cmpf olt, %21, %22 : vector<16x1xf32>
    %cst_6 = arith.constant dense<0.000000e+00> : vector<16xf32>
    %24 = vector.multi_reduction <add>, %3, %cst_6 [1] : vector<16x128xf32> to vector<16xf32>
    %25 = vector.shape_cast %24 : vector<16xf32> to vector<16x1xf32>
    %cst_7 = arith.constant 1.000000e+02 : f32
    %26 = vector.broadcast %cst_7 : f32 to vector<16x1xf32>
    %27 = arith.subf %25, %26 : vector<16x1xf32>
    %28 = arith.mulf %27, %27 : vector<16x1xf32>
    %cst_8 = arith.constant dense<true> : vector<16x1xi1>
    %29 = arith.xori %23, %cst_8 : vector<16x1xi1>
    %30 = arith.andi %12, %29 : vector<16x1xi1>
    %cst_9 = arith.constant 0.000000e+00 : f32
    %31 = vector.broadcast %cst_9 : f32 to vector<16x1xf32>
    %32 = arith.select %30, %28, %31 : vector<16x1xi1>, vector<16x1xf32>
    %c0_10 = arith.constant 0 : index
    %c0_11 = arith.constant 0 : index
    %c0_12 = arith.constant 0 : index
    %33 = vector.load %arg4[%c0_10, %c0_11, %c0_12] : memref<1x8x128xf32, #tpu.memory_space<vmem>>, vector<1x8x128xf32>
    %34 = vector.shape_cast %18 : vector<16x128xf32> to vector<2x8x128xf32>
    %cst_13 = arith.constant dense<0.000000e+00> : vector<8x128xf32>
    %35 = vector.multi_reduction <add>, %34, %cst_13 [0] : vector<2x8x128xf32> to vector<8x128xf32>
    %36 = vector.shape_cast %35 : vector<8x128xf32> to vector<1x8x128xf32>
    %37 = arith.addf %33, %36 : vector<1x8x128xf32>
    %c0_14 = arith.constant 0 : index
    %c0_15 = arith.constant 0 : index
    %c0_16 = arith.constant 0 : index
    %38 = vector.load %arg4[%c0_14, %c0_15, %c0_16] : memref<1x8x128xf32, #tpu.memory_space<vmem>>, vector<1x8x128xf32>
    tpu.vector_store %arg4[%c0_14, %c0_15, %c0_16], %37 {strides = array<i32>} : memref<1x8x128xf32, #tpu.memory_space<vmem>>, vector<1x8x128xf32>,
    %c0_17 = arith.constant 0 : index
    %c0_18 = arith.constant 0 : index
    %c0_19 = arith.constant 0 : index
    %39 = vector.load %arg5[%c0_17, %c0_18, %c0_19] : memref<1x8x1xf32, #tpu.memory_space<vmem>>, vector<1x8x1xf32>
    %40 = vector.shape_cast %32 : vector<16x1xf32> to vector<2x8x1xf32>
    %cst_20 = arith.constant dense<0.000000e+00> : vector<8x1xf32>
    %41 = vector.multi_reduction <add>, %40, %cst_20 [0] : vector<2x8x1xf32> to vector<8x1xf32>
    %42 = vector.shape_cast %41 : vector<8x1xf32> to vector<1x8x1xf32>
    %43 = arith.addf %39, %42 : vector<1x8x1xf32>
    %c0_21 = arith.constant 0 : index
    %c0_22 = arith.constant 0 : index
    %c0_23 = arith.constant 0 : index
    %44 = vector.load %arg5[%c0_21, %c0_22, %c0_23] : memref<1x8x1xf32, #tpu.memory_space<vmem>>, vector<1x8x1xf32>
    tpu.vector_store %arg5[%c0_21, %c0_22, %c0_23], %43 {strides = array<i32>} : memref<1x8x1xf32, #tpu.memory_space<vmem>>, vector<1x8x1xf32>,
    return
  }
  func.func @transform_0(%arg0: i32, %arg1: i32) -> (i32, i32) {
    %c1_i32 = arith.constant 1 : i32
    %0 = arith.muli %arg0, %c1_i32 : i32
    %1 = arith.addi %0, %arg1 : i32
    %c1_i32_0 = arith.constant 1 : i32
    %2 = arith.minsi %1, %c1_i32_0 : i32
    %c0_i32 = arith.constant 0 : i32
    %c0_i32_1 = arith.constant 0 : i32
    return %2, %c0_i32 : i32, i32
  }
  func.func @transform_1(%arg0: i32, %arg1: i32) -> (i32, i32) {
    %c1_i32 = arith.constant 1 : i32
    %0 = arith.muli %arg0, %c1_i32 : i32
    %1 = arith.addi %0, %arg1 : i32
    %c1_i32_0 = arith.constant 1 : i32
    %2 = arith.minsi %1, %c1_i32_0 : i32
    %c0_i32 = arith.constant 0 : i32
    %c0_i32_1 = arith.constant 0 : i32
    return %2, %c0_i32 : i32, i32
  }
  func.func @transform_2(%arg0: i32, %arg1: i32) -> (i32, i32, i32) {
    %c0_i32 = arith.constant 0 : i32
    %c0_i32_0 = arith.constant 0 : i32
    %c0_i32_1 = arith.constant 0 : i32
    return %arg0, %c0_i32, %c0_i32_0 : i32, i32, i32
  }
  func.func @transform_3(%arg0: i32, %arg1: i32) -> (i32, i32, i32) {
    %c0_i32 = arith.constant 0 : i32
    %c0_i32_0 = arith.constant 0 : i32
    %c0_i32_1 = arith.constant 0 : i32
    return %arg0, %c0_i32, %c0_i32_0 : i32, i32, i32
  }
}

</mosaic_0001>

<bundles_post_ra>
// kernel: tpu_custom_call.1
= control target key start
LH: loop header
LB: loop body
LE: loop exit
PB: predicated region body
PF: predicated region fallthrough
CT: control target
= control target key end

     0   :  { %9 = vsyncpa [#allocation3], 0  ;;  %s1086_s0 = inlined_call_operand.hbm [shape: f32[20,128], index: 0, kind: input, shape index: {}]   ;;  %s1087_s1 = inlined_call_operand.hbm [shape: f32[20,128], index: 1, kind: input, shape index: {}]   ;;  %s1088_s2 = inlined_call_operand.hbm [shape: f32[2,8,128], index: 2, kind: output, shape index: {0}]   ;;  %s1089_s3 = inlined_call_operand.vmem [shape: f32[2,8,1], index: 3, kind: output, shape index: {1}]  }
   0x1   :  { %11 = vsyncpa [#allocation3 + $0x1], 0 }
   0x2   :  { %12 = vsyncpa [#allocation6], 0 }
   0x3   :  { %14 = vsyncpa [#allocation6 + $0x1], 0 }
   0x4   :  { %15 = vsyncpa [#allocation4], 0 }
   0x5   :  { %17 = vsyncpa [#allocation4 + $0x1], 0  ;;  %s822_s12 = smov 0   ;;  %s824_s13 = smov 0  }
   0x6   :  { %s826_s14 = smov 0   ;;  %s828_s15 = smov 0  }
   0x7   :  { %s830_s16 = smov 0   ;;  %s832_s17 = smov 0  }
   0x8   :  { %s834_s18 = smov 0   ;;  %s836_s19 = smov 0  }
   0x9   :  { %s838_s20 = smov 0  }
   0xa LB: > { %1094 = sst [smem:[#allocation11_spill]] %s787_s19  ;;  %s506_s21 = sadd.s32 4294967295, %s791_s20   ;;  %s791_s20 = sphi %s838_s20, %s23_s20   ;;  %s787_s19 = sphi %s836_s19, %s1104_s19   ;;  %s783_s18 = sphi %s834_s18, %s1103_s18   ;;  %s779_s17 = sphi %s832_s17, %s1110_s17   ;;  %s775_s16 = sphi %s830_s16, %s1109_s16   ;;  %s771_s15 = sphi %s828_s15, %s1108_s15   ;;  %s767_s14 = sphi %s826_s14, %s1107_s14   ;;  %s763_s13 = sphi %s824_s13, %s1106_s13   ;;  %s759_s12 = sphi %s822_s12, %s1105_s12  }
   0xb   : > { %s507_s22 = sadd.s32 4294967294, %s791_s20   ;;  %s35_s23 = sadd.s32 1, %s787_s19 }
   0xc   : > { %p40_p0 = scmp.lt.s32.totalorder %s787_s19, 1  ;;  %p37_p1 = scmp.ge.s32.totalorder %s35_s23, 2 }
   0xd   : > { %s48_s24 = sadd.s32 1, %s779_s17  ;;  %p55_p2 = scmp.ne.s32.totalorder %s779_s17, %s775_s16 }
   0xe   : > { %s871_s25 = scalar_select %p40_p0, %s787_s19, 1 }
   0xf   : > { %s1112_s23 = smov (%p37_p1, %s35_s23), 0  ;;  %p56_p3 = scmp.eq.s32.totalorder %s791_s20, 0 }
  0x10   : > { %1095 = sst [smem:[#allocation12_spill]] %s1112_s23  ;;  %p43_p4 = scmp.lt.s32.totalorder %s1112_s23, 1 }
  0x11   : > { %p61_p5 = scmp.ne.s32.totalorder %s775_s16, %s771_s15  ;;  %p880_p6 = por %p56_p3, %p55_p2 }
  0x12   : > { %p62_p7 = scmp.eq.s32.totalorder %s506_s21, 0  ;;  %s103_s29 = ssub.s32 %s787_s19, %s1112_s23 }
  0x13   : > { %s44_s27 = scalar_select %p43_p4, %s1112_s23, 1 }
  0x14   : > { %p885_p8 = por %p62_p7, %p61_p5  ;;  %p104_p9 = scmp.eq.s32.totalorder %s103_s29, 0 }
  0x15   : > { %s45_s30 = ssub.s32 %s871_s25, %s44_s27  ;;  %s106_s4 = sadd.s32 1, %s767_s14 }
  0x16   : > { %p46_p10 = scmp.eq.s32.totalorder %s45_s30, 0  ;;  %p116_p11 = scmp.ne.s32.totalorder %s767_s14, %s763_s13 }
  0x17   : > { %s894_s5 = scalar_select %p104_p9, %s767_s14, %s106_s4  }
  0x18   : > { %s897_s6 = scalar_select %p46_p10, %s779_s17, %s48_s24  }
  0x19   : > { %p117_p12 = scmp.eq.s32.totalorder %s506_s21, 1  ;;  %p122_p13 = scmp.ne.s32.totalorder %s763_s13, %s759_s12 }
  0x1a   : > { %p123_p0 = scmp.eq.s32.totalorder %s507_s22, 1  ;;  %p1092_p3 = scmp.ge.s32.totalorder %s791_s20, 2 }
  0x1b   : > { %p903_p1 = por %p117_p12, %p116_p11 }
  0x1c   : > { %p907_p2 = por %p123_p0, %p122_p13  ;;  %165 = sbr.rel (%p1092_p3) target bundleno = 105 (0x69), region = 16 }
  0x1d   : > { %s1098_s7 = scalar_select %p903_p1, 1, 0 }
  0x1e   : > { %s1099_s8 = scalar_select %p907_p2, 1, 0 }
  0x23   : > { %168 = sbr.rel (!%p880_p6) target bundleno = 70 (0x46), region = 20  ;;  %s169_s9 = sand.u32 (%p880_p6), 1, %s779_s17  }
  0x24   : > { %s511_s10 = sshll.u32 (%p880_p6), %s871_s25, 1  ;;  %s510_s11 = sshll.u32 (%p880_p6), %s169_s9, 4 }
  0x25   : > { %s178_s15 = ssub.s32 (%p880_p6), 3, %s511_s10  ;;  %s921_s24 = scalar_lea.sflag (%p880_p6), [#allocation3], %s169_s9 }
  0x26   : > { %p179_p4 = scmp.lt.s32.totalorder (%p880_p6), %s178_s15, 2  ;;  %s173_s27 = scalar_lea.vmem (%p880_p6), [#allocation2], %s510_s11 }
  0x2a   : > { %s1114_s15 = smov (!%p179_p4, %s178_s15), 2 }
  0x2b   : > { %s918_s21 = sshll.u32 %s1114_s15, 7 }
  0x2c   : > { %s183_s22 = ssub.s32 256, %s918_s21 }
  0x2d   : > { %184 = vsyncadd %s921_s24, %s183_s22  ;;  %p513_p5 = scmp.ne.s32.totalorder %s918_s21, 0  ;;  %s536_s29 = sshll.u32 %s871_s25, 8 }
  0x2e   : > { %s929_s10 = scalar_lea.hbm %s1086_s0, %s536_s29  ;;  %s189_s9 = sshll.u32 %s173_s27, 4  ;;  %s931_s9 = int_to_ptr.vmem [resolvable:$true] %s189_s9 }
  0x2f   : > { %s625_s11 = scalar_lea.hbm %s929_s10, %s918_s21  ;;  %s629_s23 = scalar_lea.hbm %s1086_s0, 384 }
  0x30   : > { %p626_p7 = scmp.ne.s32.totalorder %s929_s10, %s625_s11  ;;  %p630_p11 = scmp.lt.u32.totalorder %s929_s10, %s1086_s0 }
  0x31   : > { %p631_p12 = scmp.lt.u32.totalorder %s629_s23, %s625_s11  ;;  %p633_p0 = scmp.lt.u32.totalorder %s625_s11, %s929_s10 }
  0x32   : > { %p627_p9 = pnand %p626_p7, %p513_p5 }
  0x33   : > { %p632_p13 = por %p631_p12, %p630_p11 }
  0x34   : > { %p628_p10 = pneg %p627_p9 }
  0x35   : > { %p634_p4 = por %p633_p0, %p632_p13 }
  0x37   : > { %p635_p3 = pnand %p634_p4, %p628_p10 }
  0x39   : > { %638 = shalt.err (!%p635_p3)
}
  0x3a   : > { %s639_s27 = scalar_lea.vmem %s931_s9, %s918_s21  ;;  %s793_s29 = smov [#allocation2]  }
  0x3b   : > { %p640_p7 = scmp.ne.s32.totalorder %s931_s9, %s639_s27  ;;  %s643_s4 = sshll.u32 %s793_s29, 4  ;;  %s644_s4 = int_to_ptr.vmem [resolvable:$false] %s643_s4 }
  0x3c   : > { %s645_s19 = scalar_lea.vmem %s644_s4, 512  ;;  %p646_p1 = scmp.lt.s32.totalorder %s931_s9, %s644_s4 }
  0x3d   : > { %p641_p9 = pnand %p640_p7, %p513_p5  ;;  %p647_p11 = scmp.lt.s32.totalorder %s645_s19, %s639_s27 }
  0x3f   : > { %p642_p2 = pneg %p641_p9  ;;  %p648_p12 = por %p647_p11, %p646_p1 }
  0x41   : > { %p649_p13 = pnand %p648_p12, %p642_p2 }
  0x43   : > { %652 = shalt.err (!%p649_p13)
}
  0x44   : > { %s794_s23 = smov 128   ;;  %s795_s11 = smov 8  }
  0x45   : > { %195 = dma.hbm_to_vmem [thread:$0]  (%p513_p5), %s929_s10, %s918_s21, %s931_s9, %s921_s24, %s794_s23, %s794_s23, %s795_s11  }
  0x46 PF: > { %198 = sbr.rel (!%p880_p6) target bundleno = 105 (0x69), region = 24  ;;  %s199_s15 = sand.u32 (%p880_p6), 1, %s779_s17  }
  0x47   : > { %s518_s22 = sshll.u32 (%p880_p6), %s871_s25, 1  ;;  %s517_s30 = sshll.u32 (%p880_p6), %s199_s15, 4 }
  0x48   : > { %s208_s27 = ssub.s32 (%p880_p6), 3, %s518_s22  ;;  %s965_s19 = scalar_lea.sflag (%p880_p6), [#allocation6], %s199_s15 }
  0x49   : > { %p209_p1 = scmp.lt.s32.totalorder (%p880_p6), %s208_s27, 2  ;;  %s203_s21 = scalar_lea.vmem (%p880_p6), [#allocation5], %s517_s30 }
  0x4d   : > { %s1116_s27 = smov (!%p209_p1, %s208_s27), 2 }
  0x4e   : > { %s962_s29 = sshll.u32 %s1116_s27, 7 }
  0x4f   : > { %s213_s4 = ssub.s32 256, %s962_s29 }
  0x50   : > { %214 = vsyncadd %s965_s19, %s213_s4  ;;  %p520_p6 = scmp.ne.s32.totalorder %s962_s29, 0  ;;  %s537_s26 = sshll.u32 %s871_s25, 8 }
  0x51   : > { %s973_s9 = scalar_lea.hbm %s1087_s1, %s537_s26  ;;  %s219_s23 = sshll.u32 %s203_s21, 4  ;;  %s975_s23 = int_to_ptr.vmem [resolvable:$true] %s219_s23 }
  0x52   : > { %s653_s11 = scalar_lea.hbm %s973_s9, %s962_s29  ;;  %s657_s25 = scalar_lea.hbm %s1087_s1, 384 }
  0x53   : > { %p654_p2 = scmp.ne.s32.totalorder %s973_s9, %s653_s11  ;;  %p658_p10 = scmp.lt.u32.totalorder %s973_s9, %s1087_s1 }
  0x54   : > { %p659_p0 = scmp.lt.u32.totalorder %s657_s25, %s653_s11  ;;  %p661_p7 = scmp.lt.u32.totalorder %s653_s11, %s973_s9 }
  0x55   : > { %p655_p3 = pnand %p654_p2, %p520_p6 }
  0x56   : > { %p660_p4 = por %p659_p0, %p658_p10 }
  0x57   : > { %p656_p5 = pneg %p655_p3 }
  0x58   : > { %p662_p9 = por %p661_p7, %p660_p4 }
  0x5a   : > { %p663_p11 = pnand %p662_p9, %p656_p5 }
  0x5c   : > { %666 = shalt.err (!%p663_p11)
}
  0x5d   : > { %s667_s4 = scalar_lea.vmem %s975_s23, %s962_s29  ;;  %s796_s21 = smov [#allocation5]  }
  0x5e   : > { %p668_p12 = scmp.ne.s32.totalorder %s975_s23, %s667_s4  ;;  %s671_s26 = sshll.u32 %s796_s21, 4  ;;  %s672_s26 = int_to_ptr.vmem [resolvable:$false] %s671_s26 }
  0x5f   : > { %s673_s24 = scalar_lea.vmem %s672_s26, 512  ;;  %p674_p2 = scmp.lt.s32.totalorder %s975_s23, %s672_s26 }
  0x60   : > { %p669_p13 = pnand %p668_p12, %p520_p6  ;;  %p675_p3 = scmp.lt.s32.totalorder %s673_s24, %s667_s4 }
  0x62   : > { %p670_p1 = pneg %p669_p13  ;;  %p676_p10 = por %p675_p3, %p674_p2 }
  0x64   : > { %p677_p0 = pnand %p676_p10, %p670_p1 }
  0x66   : > { %680 = shalt.err (!%p677_p0)
}
  0x67   : > { %s797_s10 = smov 128   ;;  %s798_s11 = smov 8  }
  0x68   : > { %225 = dma.hbm_to_vmem [thread:$0]  (%p520_p6), %s973_s9, %s962_s29, %s975_s23, %s965_s19, %s797_s10, %s797_s10, %s798_s11  }
  0x69 PF: > { %p524_p5 = scmp.ge.s32.totalorder %s791_s20, 1  ;;  %p227_p4 = scmp.lt.s32.totalorder %s791_s20, 3 }
  0x6b   : > { %p228_p7 = pnand %p524_p5, %p227_p4 }
  0x6c   : > { %s233_s15 = sand.u32 (!%p228_p7), 1, %s775_s16  }
  0x6d   : > { %231 = sbr.rel (%p228_p7) target bundleno = 277 (0x115), region = 28  ;;  %s525_s22 = sshll.u32 (!%p228_p7), %s233_s15, 4 }
  0x6e   : > { %s234_s25 = scalar_lea.sflag (!%p228_p7), [#allocation3], %s233_s15  ;;  %s237_s30 = scalar_lea.vmem (!%p228_p7), [#allocation2], %s525_s22 }
  0x74   : > { %746 = dma.done.wait (%p885_p8), %s234_s25, 256  }
  0x75   : > { %748 = vsyncadd (%p885_p8), %s234_s25, 4294967040  ;;  %s243_s29 = scalar_lea.sflag [#allocation6], %s233_s15  ;;  %s246_s19 = scalar_lea.vmem [#allocation5], %s525_s22 }
  0x76   : > { %750 = dma.done.wait (%p885_p8), %s243_s29, 256  }
  0x77   : > { %752 = vsyncadd (%p885_p8), %s243_s29, 4294967040  ;;  %v305_v0 = vld [vmem:[%s237_s30] sm:$0xff]  ;;  %v306_v1 = vld [vmem:[%s237_s30 + $0x8] sm:$0xff]  ;;  %v311_v6 = vlaneseq  ;;  %p294_p6 = scmp.lt.s32.totalorder %s783_s18, 1  ;;  %s529_s9 = sshll.u32 %s783_s18, 4  ;;  %vm303_vm0 = vcmask 7168  }
  0x78   : > { %337 = vadd.xlane.f32.xlu0 %v305_v0  ;;  %v329_v2 = vand.u32 2147483647, %v305_v0  ;;  %v330_v3 = vand.u32 2147483647, %v306_v1  ;;  %v307_v4 = vld [vmem:[%s246_s19] sm:$0xff]  ;;  %v308_v5 = vld [vmem:[%s246_s19 + $0x8] sm:$0xff]  ;;  %v314_v10 = vstv %s529_s9 }
  0x79   : > { %v319_v7 = vsub.f32 %v305_v0, %v307_v4  ;;  %v312_v8 = vshrl.u32 %v311_v6, 7  ;;  %v320_v9 = vsub.f32 %v306_v1, %v308_v5  ;;  %s295_s28 = scalar_select %p294_p6, %s783_s18, 1  ;;  %v799_v15 = vmov 0.0  }
  0x7a   : > { %331 = vmax.xlane.f32.xlu1 %v329_v2  ;;  %s269_s26 = sand.u32 1, %s763_s13   ;;  %s533_s10 = sshll.u32 %s783_s18, 7 }
  0x7b   : > { %v315_v11 = vadd.s32 %v314_v10, %v312_v8  ;;  %v321_v12 = vmul.f32 %v319_v7, %v319_v7  ;;  %s528_s23 = sshll.u32 %s295_s28, 3  ;;  %v313_v13 = vadd.s32 8, %v312_v8  ;;  %v322_v14 = vmul.f32 %v320_v9, %v320_v9  ;;  %s527_s24 = sshll.u32 %s269_s26, 3 }
  0x7c   : > { %339 = vadd.xlane.f32.xlu0 %v306_v1  ;;  %s1019_s21 = scalar_lea.vmem %s1089_s3, %s528_s23  ;;  %s271_s11 = scalar_lea.vmem [#allocation7], %s527_s24 }
  0x7d   : > { %304 = vst.msk [vmem:[%s1019_s21] sm:$0xff] %vm303_vm0, %v799_v15  ;;  %vm317_vm1 = vcmp.lt.s32.totalorder %v315_v11, 20  ;;  %v316_v16 = vadd.s32 %v314_v10, %v313_v13  ;;  %s378_s15 = sshll.u32 %s271_s11, 4  ;;  %s1030_s30 = scalar_lea.hbm %s1088_s2, %s533_s10  ;;  %s379_s15 = int_to_ptr.vmem [resolvable:$true] %s378_s15 }
  0x7e   : > { %333 = vmax.xlane.f32.xlu1 %v330_v3  ;;  %v327_v17 = vsel %vm317_vm1, %v321_v12, 0.0  ;;  %s361_s29 = scalar_lea.sflag [#allocation4], %s269_s26  ;;  %s681_s19 = scalar_lea.vmem %s379_s15, 128 }
  0x7f   : > { %vm318_vm2 = vcmp.lt.s32.totalorder %v316_v16, 20  ;;  %p682_p8 = scmp.ne.s32.totalorder %s379_s15, %s681_s19  ;;  %p1100_p9 = scmp.ne.s32.totalorder %s1098_s7, 0 }
  0x80   : > { %v328_v18 = vsel %vm318_vm2, %v322_v14, 0.0  ;;  %s800_s9 = smov [#allocation7]  }
  0x81   : > { %v352_v19 = vadd.f32 %v328_v18, %v327_v17  ;;  %p683_p11 = pnand %p682_p8, %p1100_p9  ;;  %s685_s28 = sshll.u32 %s800_s9, 4  ;;  %s686_s28 = int_to_ptr.vmem [resolvable:$false] %s685_s28 }
  0x82   : > { %s687_s23 = scalar_lea.vmem %s686_s28, 256  ;;  %p688_p13 = scmp.lt.s32.totalorder %s379_s15, %s686_s28 }
  0x83   : > { %354 = vst [vmem:[%s271_s11] sm:$0xff] %v352_v19  ;;  %p684_p12 = pneg %p683_p11  ;;  %p689_p1 = scmp.lt.s32.totalorder %s687_s23, %s681_s19 }
  0x85   : > { %p690_p2 = por %p689_p1, %p688_p13 }
  0x87   : > { %p691_p3 = pnand %p690_p2, %p684_p12 }
  0x89   : > { %694 = shalt.err (!%p691_p3)
}
  0x8a   : > { %s695_s18 = scalar_lea.hbm %s1030_s30, 128  ;;  %s699_s26 = scalar_lea.hbm %s1088_s2, 256 }
  0x8b   : > { %p696_p10 = scmp.ne.s32.totalorder %s1030_s30, %s695_s18  ;;  %p700_p4 = scmp.lt.u32.totalorder %s1030_s30, %s1088_s2 }
  0x8c   : > { %p701_p7 = scmp.lt.u32.totalorder %s699_s26, %s695_s18  ;;  %p703_p8 = scmp.lt.u32.totalorder %s695_s18, %s1030_s30 }
  0x8d   : > { %p697_p0 = pnand %p696_p10, %p1100_p9 }
  0x8e   : > { %p702_p6 = por %p701_p7, %p700_p4 }
  0x8f   : > { %p698_p5 = pneg %p697_p0 }
  0x90   : > { %p704_p11 = por %p703_p8, %p702_p6 }
  0x92   : > { %p705_p12 = pnand %p704_p11, %p698_p5 }
  0x94   : > { %708 = shalt.err (!%p705_p12)
}
  0x95   : > { %540 = dma.vmem_to_hbm [thread:$0]  (%p1100_p9), %s379_s15, 128, %s1030_s30, %s361_s29   ;;  %vm801_vm4 = vmmov 1   ;;  %v355_v30 = vld [vmem:[%s1019_s21] sm:$0xff] }
 0x105   : > { %v338_v20 = vpop.xlane.xlu0 %337 }
 0x106   : > { %v530_v21 = vadd.f32 -100.0, %v338_v20 }
 0x107   : > { %v332_v22 = vpop.xlane.xlu1 %331 }
 0x108   : > { %vm335_vm3 = vcmp.lt.f32.partialorder %v332_v22, 1.0  ;;  %v343_v25 = vmul.f32 %v530_v21, %v530_v21 }
 0x109   : > { %vm345_vm5 = vmxor %vm335_vm3, %vm801_vm4  ;;  %v340_v23 = vpop.xlane.xlu0 %339 }
 0x10a   : > { %v531_v24 = vadd.f32 -100.0, %v340_v23  ;;  %vm347_vm6 = vmand %vm317_vm1, %vm345_vm5 }
 0x10b   : > { %v334_v26 = vpop.xlane.xlu1 %333  ;;  %v349_v28 = vsel %vm347_vm6, %v343_v25, 0.0 }
 0x10c   : > { %v344_v27 = vmul.f32 %v531_v24, %v531_v24  ;;  %vm336_vm7 = vcmp.lt.f32.partialorder %v334_v26, 1.0 }
 0x10d   : > { %vm346_vm8 = vmxor %vm336_vm7, %vm801_vm4 }
 0x10e   : > { %vm348_vm9 = vmand %vm318_vm2, %vm346_vm8 }
 0x10f   : > { %v350_v29 = vsel %vm348_vm9, %v344_v27, 0.0 }
 0x110   : > { %v356_v31 = vadd.f32 %v350_v29, %v349_v28 }
 0x112   : > { %v357_v32 = vadd.f32 %v356_v31, %v355_v30 }
 0x114   : > { %359 = vst.msk [vmem:[%s1019_s21] sm:$0xff] %vm303_vm0, %v357_v32 }
 0x115 PF: > { %s393_s7 = sand.u32 1, %s759_s12   ;;  %p1101_p9 = scmp.ne.s32.totalorder %s1099_s8, 0 }
 0x116   : > { %p1102_p13 = scmp.ge.s32.totalorder %s791_s20, 2  ;;  %s394_s11 = scalar_lea.sflag [#allocation4], %s393_s7 }
 0x118   : > { %p543_p1 = pnand %p1102_p13, %p1101_p9 }
 0x11a   : > { %754 = dma.done.wait (!%p543_p1), %s394_s11, 128  }
 0x11b   : > { %756 = vsyncadd (!%p543_p1), %s394_s11, 4294967168  ;;  %s23_s20 = sadd.s32 1, %s791_s20   ;;  %s1103_s18 = sld [smem:[#allocation11_spill]] }
 0x11c   : > { %p20_p2 = scmp.ge.s32.totalorder %s23_s20, 4   ;;  %s1104_s19 = sld [smem:[#allocation12_spill]] }
 0x11d   : > { %s1105_s12 = smov %s763_s13  ;;  %s1106_s13 = smov %s767_s14 }
 0x11e   : > { %s1107_s14 = smov %s894_s5  ;;  %s1108_s15 = smov %s775_s16 }
 0x11f   : > { %s1109_s16 = smov %s779_s17  ;;  %s1110_s17 = smov %s897_s6 }
 0x120   :  { %22 = sbr.rel (!%p20_p2) target bundleno = 10 (0xa), region = 102 }
 0x127   :  { %406 = vsyncpa [#allocation3], 1 }
 0x128   :  { %408 = vsyncpa [#allocation3 + $0x1], 1 }
 0x129   :  { %409 = vsyncpa [#allocation6], 1 }
 0x12a   :  { %411 = vsyncpa [#allocation6 + $0x1], 1 }
 0x12b   :  { %412 = vsyncpa [#allocation4], 1 }
 0x12c   :  { %414 = vsyncpa [#allocation4 + $0x1], 1 }

</bundles_post_ra>
